<compile_context>
chip_gen: v5e
topology: v5e:2x2
jax: 0.10.0
libtpu: 0.0.40
codegen_flags: <defaults>
</compile_context>

<pallas_src>
import functools

import jax
import jax.numpy as jnp
from jax.experimental import pallas as pl
from jax.experimental.pallas import tpu as pltpu

IGNORE_INDEX = -100  # PyTorch F.cross_entropy default


def _ce_partial_kernel(logits_ref, labels_ref, out_ref, *, block_n, n_valid):
    i = pl.program_id(0)

    x = logits_ref[...].astype(jnp.float32)                 # (block_n, C) upcast in VMEM
    bn, c = x.shape

    # Numerically-stable log-sum-exp along the class (lane) axis.
    m = jnp.max(x, axis=-1, keepdims=True)                  # (bn, 1)
    z = x - m
    lse = jnp.log(jnp.sum(jnp.exp(z), axis=-1, keepdims=True))  # (bn, 1)

    # Fused gather: pick z at the target class directly (no (bn, C) logp temporary).
    cls_ids = jax.lax.broadcasted_iota(jnp.int32, (bn, c), 1)
    tgt = labels_ref[...]                                    # (bn, 1) int32
    picked_z = jnp.sum(jnp.where(cls_ids == tgt, z, 0.0),
                       axis=-1, keepdims=True)               # (bn, 1)

    nll = lse - picked_z                                     # (bn, 1) = -log_softmax[target]

    # Mask padded rows (row index >= n_valid) and ignore_index labels.
    row_id = i * block_n + jax.lax.broadcasted_iota(jnp.int32, (bn, 1), 0)
    valid = (row_id < n_valid) & (tgt != IGNORE_INDEX)
    partial = jnp.sum(jnp.where(valid, nll, 0.0))            # scalar partial sum

    # Lane-dense, fully (8,128)-aligned output tile; partial lives at [0, 0].
    r_io = jax.lax.broadcasted_iota(jnp.int32, (8, 128), 0)
    c_io = jax.lax.broadcasted_iota(jnp.int32, (8, 128), 1)
    out_ref[...] = jnp.where((r_io == 0) & (c_io == 0), partial, 0.0)


def ce_loss(stu_pred: jax.Array, label: jax.Array, *, block_n: int | None = None) -> jax.Array:
    """Equivalent of F.cross_entropy(stu_pred, label) (mean reduction, ignore_index=-100).

    stu_pred: (N, C) float logits (f32 or bf16 — streamed in native dtype)
    label:    (N,)   integer class indices
    Returns a scalar float32 loss.
    """
    n, c = stu_pred.shape
    itemsize = jnp.dtype(stu_pred.dtype).itemsize

    if block_n is None:
        # Keep 2x (double buffer) x block bytes comfortably inside every gen's scoped VMEM.
        per_buffer_budget = 6 * 1024 * 1024
        bytes_per_row = max(c * itemsize, 1)
        block_n = min(512, max(8, per_buffer_budget // bytes_per_row))
    # Multiple of 8 sublanes, never larger than the (padded) batch.
    block_n = max(8, (min(block_n, max(8, ((n + 7) // 8) * 8)) // 8) * 8)

    n_pad = pl.cdiv(n, block_n) * block_n
    grid_n = n_pad // block_n

    labels_i32 = label.astype(jnp.int32)
    logits_p = stu_pred
    labels_p = labels_i32
    if n_pad != n:
        logits_p = jnp.pad(stu_pred, ((0, n_pad - n), (0, 0)))
        labels_p = jnp.pad(labels_i32, ((0, n_pad - n),), constant_values=IGNORE_INDEX)
    labels_2d = labels_p.reshape(n_pad, 1)

    kernel = functools.partial(_ce_partial_kernel, block_n=block_n, n_valid=n)

    cost = pl.CostEstimate(
        flops=4 * n * c,
        transcendentals=n * c,
        bytes_accessed=n * c * itemsize + n * 4 + grid_n * 8 * 128 * 4,
    )

    partials = pl.pallas_call(
        kernel,
        out_shape=jax.ShapeDtypeStruct((grid_n * 8, 128), jnp.float32),
        grid=(grid_n,),
        in_specs=[
            pl.BlockSpec((block_n, c), lambda i: (i, 0)),   # logits row tile (native dtype)
            pl.BlockSpec((block_n, 1), lambda i: (i, 0)),   # labels row tile
        ],
        out_specs=pl.BlockSpec((8, 128), lambda i: (i, 0)),  # per-block lane-dense partial
        compiler_params=pltpu.CompilerParams(
            dimension_semantics=("parallel",),               # rows are independent
        ),
        cost_estimate=cost,
    )(logits_p, labels_2d)

    # Tiny final reduction in plain JAX; denominator = number of non-ignored labels.
    denom = jnp.maximum(jnp.sum((labels_i32 != IGNORE_INDEX).astype(jnp.float32)), 1.0)
    return jnp.sum(partials) / denom


def ce_loss_reference(stu_pred, label):
    """Plain-JAX reference (mean over non-ignored labels)."""
    logp = jax.nn.log_softmax(stu_pred.astype(jnp.float32), axis=-1)
    lbl = label.astype(jnp.int32)
    picked = jnp.take_along_axis(logp, jnp.clip(lbl, 0, None)[:, None], axis=-1)[:, 0]
    valid = (lbl != IGNORE_INDEX).astype(jnp.float32)
    return -jnp.sum(picked * valid) / jnp.maximum(jnp.sum(valid), 1.0)


if __name__ == "__main__":
    key = jax.random.PRNGKey(0)

    # Test 1: small f32 case matching the module's typical use.
    k1, k2 = jax.random.split(key)
    N, C = 8, 32
    stu_pred = jax.random.normal(k1, (N, C), dtype=jnp.float32)
    label = jax.random.randint(k2, (N,), 0, C, dtype=jnp.int32)
    loss = ce_loss(stu_pred, label)
    jax.block_until_ready(loss)
    ref = ce_loss_reference(stu_pred, label)
    assert jnp.allclose(loss, ref, rtol=1e-5, atol=1e-5), (loss, ref)

    # Test 2: bf16 logits streamed in native dtype (no wrapper f32 cast).
    k3, k4 = jax.random.split(k1)
    N2, C2 = 37, 160
    logits_bf16 = jax.random.normal(k3, (N2, C2), dtype=jnp.float32).astype(jnp.bfloat16)
    label2 = jax.random.randint(k4, (N2,), 0, C2, dtype=jnp.int32)
    loss2 = ce_loss(logits_bf16, label2)
    jax.block_until_ready(loss2)
    ref2 = ce_loss_reference(logits_bf16, label2)
    assert jnp.allclose(loss2, ref2, rtol=1e-4, atol=1e-4), (loss2, ref2)

    # Test 3: multi-block grid with row padding (N not a multiple of block_n).
    k5, k6 = jax.random.split(k3)
    N3, C3 = 50, 32
    logits3 = jax.random.normal(k5, (N3, C3), dtype=jnp.float32)
    label3 = jax.random.randint(k6, (N3,), 0, C3, dtype=jnp.int32)
    loss3 = ce_loss(logits3, label3, block_n=16)   # grid_n = 4, last block padded
    jax.block_until_ready(loss3)
    ref3 = ce_loss_reference(logits3, label3)
    assert jnp.allclose(loss3, ref3, rtol=1e-5, atol=1e-5), (loss3, ref3)

    print("KERNEL_OK")
</pallas_src>

<mosaic_0001>
module attributes {stable_mosaic.version = 11 : i64} {
  func.func @_ce_partial_kernel(%arg0: i32, %arg1: memref<8x32xf32, #tpu.memory_space<vmem>>, %arg2: memref<8x1xi32, #tpu.memory_space<vmem>>, %arg3: memref<8x128xf32, #tpu.memory_space<vmem>>) attributes {dimension_semantics = [#tpu.dimension_semantics<parallel>], iteration_bounds = array<i64: 1>, scalar_prefetch = 0 : i64, scratch_operands = 0 : i64, tpu.core_type = #tpu.core_type<tc>, window_params = [{transform_indices = @transform_0, window_bounds = array<i64: 8, 32>}, {transform_indices = @transform_1, window_bounds = array<i64: 8, 1>}, {transform_indices = @transform_2, window_bounds = array<i64: 8, 128>}]} {
    %c0 = arith.constant 0 : index
    %c0_0 = arith.constant 0 : index
    %0 = vector.load %arg1[%c0, %c0_0] : memref<8x32xf32, #tpu.memory_space<vmem>>, vector<8x32xf32>
    %cst = arith.constant dense<0xFF800000> : vector<8xf32>
    %1 = vector.multi_reduction <maximumf>, %0, %cst [1] : vector<8x32xf32> to vector<8xf32>
    %2 = vector.shape_cast %1 : vector<8xf32> to vector<8x1xf32>
    %3 = vector.broadcast %2 : vector<8x1xf32> to vector<8x32xf32>
    %4 = arith.subf %0, %3 : vector<8x32xf32>
    %5 = math.exp %4 : vector<8x32xf32>
    %cst_1 = arith.constant dense<0.000000e+00> : vector<8xf32>
    %6 = vector.multi_reduction <add>, %5, %cst_1 [1] : vector<8x32xf32> to vector<8xf32>
    %7 = vector.shape_cast %6 : vector<8xf32> to vector<8x1xf32>
    %8 = math.log %7 : vector<8x1xf32>
    %9 = tpu.iota {dimensions = array<i32: 1>} : vector<8x32xi32>
    %c0_2 = arith.constant 0 : index
    %c0_3 = arith.constant 0 : index
    %10 = vector.load %arg2[%c0_2, %c0_3] : memref<8x1xi32, #tpu.memory_space<vmem>>, vector<8x1xi32>
    %11 = vector.broadcast %10 : vector<8x1xi32> to vector<8x32xi32>
    %12 = arith.cmpi eq, %9, %11 : vector<8x32xi32>
    %cst_4 = arith.constant 0.000000e+00 : f32
    %13 = vector.broadcast %cst_4 : f32 to vector<8x32xf32>
    %14 = arith.select %12, %4, %13 : vector<8x32xi1>, vector<8x32xf32>
    %cst_5 = arith.constant dense<0.000000e+00> : vector<8xf32>
    %15 = vector.multi_reduction <add>, %14, %cst_5 [1] : vector<8x32xf32> to vector<8xf32>
    %16 = vector.shape_cast %15 : vector<8xf32> to vector<8x1xf32>
    %17 = arith.subf %8, %16 : vector<8x1xf32>
    %c8_i32 = arith.constant 8 : i32
    %18 = arith.muli %arg0, %c8_i32 : i32
    %19 = tpu.iota {dimensions = array<i32: 0>} : vector<8x1xi32>
    %20 = vector.broadcast %18 : i32 to vector<8x1xi32>
    %21 = arith.addi %20, %19 : vector<8x1xi32>
    %c8_i32_6 = arith.constant 8 : i32
    %22 = vector.broadcast %c8_i32_6 : i32 to vector<8x1xi32>
    %23 = arith.cmpi slt, %21, %22 : vector<8x1xi32>
    %c-100_i32 = arith.constant -100 : i32
    %24 = vector.broadcast %c-100_i32 : i32 to vector<8x1xi32>
    %25 = arith.cmpi ne, %10, %24 : vector<8x1xi32>
    %26 = arith.andi %23, %25 : vector<8x1xi1>
    %cst_7 = arith.constant 0.000000e+00 : f32
    %27 = vector.broadcast %cst_7 : f32 to vector<8x1xf32>
    %28 = arith.select %26, %17, %27 : vector<8x1xi1>, vector<8x1xf32>
    %29 = vector.shape_cast %28 : vector<8x1xf32> to vector<1x8x1xf32>
    %cst_8 = arith.constant dense<0.000000e+00> : vector<1xf32>
    %30 = vector.multi_reduction <add>, %29, %cst_8 [1, 2] : vector<1x8x1xf32> to vector<1xf32>
    %31 = vector.shape_cast %30 : vector<1xf32> to vector<1x1x1xf32>
    %32 = vector.extract %31[0, 0, 0] : f32 from vector<1x1x1xf32>
    %33 = tpu.iota {dimensions = array<i32: 0>} : vector<8x128xi32>
    %34 = tpu.iota {dimensions = array<i32: 1>} : vector<8x128xi32>
    %c0_i32 = arith.constant 0 : i32
    %35 = vector.broadcast %c0_i32 : i32 to vector<8x128xi32>
    %36 = arith.cmpi eq, %33, %35 : vector<8x128xi32>
    %c0_i32_9 = arith.constant 0 : i32
    %37 = vector.broadcast %c0_i32_9 : i32 to vector<8x128xi32>
    %38 = arith.cmpi eq, %34, %37 : vector<8x128xi32>
    %39 = arith.andi %36, %38 : vector<8x128xi1>
    %cst_10 = arith.constant 0.000000e+00 : f32
    %40 = vector.broadcast %32 : f32 to vector<8x128xf32>
    %41 = vector.broadcast %cst_10 : f32 to vector<8x128xf32>
    %42 = arith.select %39, %40, %41 : vector<8x128xi1>, vector<8x128xf32>
    %c0_11 = arith.constant 0 : index
    %c0_12 = arith.constant 0 : index
    %43 = vector.load %arg3[%c0_11, %c0_12] : memref<8x128xf32, #tpu.memory_space<vmem>>, vector<8x128xf32>
    tpu.vector_store %arg3[%c0_11, %c0_12], %42 {strides = array<i32>} : memref<8x128xf32, #tpu.memory_space<vmem>>, vector<8x128xf32>,
    return
  }
  func.func @transform_0(%arg0: i32) -> (i32, i32) {
    %c0_i32 = arith.constant 0 : i32
    %c0_i32_0 = arith.constant 0 : i32
    return %arg0, %c0_i32 : i32, i32
  }
  func.func @transform_1(%arg0: i32) -> (i32, i32) {
    %c0_i32 = arith.constant 0 : i32
    %c0_i32_0 = arith.constant 0 : i32
    return %arg0, %c0_i32 : i32, i32
  }
  func.func @transform_2(%arg0: i32) -> (i32, i32) {
    %c0_i32 = arith.constant 0 : i32
    %c0_i32_0 = arith.constant 0 : i32
    return %arg0, %c0_i32 : i32, i32
  }
}

</mosaic_0001>

<bundles_post_ra>
// kernel: tpu_custom_call.1
= control target key start
LH: loop header
LB: loop body
LE: loop exit
PB: predicated region body
PF: predicated region fallthrough
CT: control target
= control target key end

     0   :  { %vm13_vm0 = vcmask 261120   ;;  %s143_s0 = inlined_call_operand.vmem [shape: f32[8,32], index: 0, kind: input, shape index: {}]   ;;  %s144_s1 = inlined_call_operand.vmem [shape: s32[8,1], index: 1, kind: input, shape index: {}]   ;;  %s145_s2 = inlined_call_operand.hbm [shape: f32[8,128], index: 2, kind: output, shape index: {}]  }
   0x1   :  { %v12_v0 = vld [vmem:[%s143_s0] sm:$0xff] }
   0x2   :  { %7 = vsyncpa [#allocation3], 0  ;;  %v14_v1 = vsel %vm13_vm0, %v12_v0, -inf  ;;  %v114_v2 = vmov 0   ;;  %v27_v3 = vld [vmem:[%s144_s1] sm:$0xff]  ;;  %v25_v9 = vlaneseq  ;;  %vm46_vm3 = vcmask 7168  }
   0x3   :  { %83 = vset.pattern.permute.xlu0 %v114_v2  ;;  %vm43_vm2 = vcmp.ne.s32.totalorder %v27_v3, 4294967196  ;;  %s115_s0 = smov [#allocation2]   ;;  %s70_s15 = sshll.u32 %s145_s2, 4  ;;  %s71_s15 = int_to_ptr.hbm [resolvable:$true] %s70_s15 }
   0x4   :  { %15 = vmax.xlane.f32.xlu0 %v14_v1  ;;  %v26_v10 = vand.u32 127, %v25_v9  ;;  %v39_v28 = vshrl.u32 %v25_v9, 7  ;;  %s68_s1 = sshll.u32 %s115_s0, 4  ;;  %s69_s1 = int_to_ptr.vmem [resolvable:$true] %s68_s1 }
   0x6   :  { %vm57_vm4 = vcmp.eq.s32.totalorder %v39_v28, 0  ;;  %vm58_vm5 = vcmp.eq.s32.totalorder %v26_v10, 0 }
   0x7   :  { %vm59_vm6 = vmand %vm57_vm4, %vm58_vm5 }
  0x18   :  { %29 = vperm.xlu0 %83, %v27_v3  }
  0x77   :  { %v16_v4 = vpop.xlane.xlu0 %15 }
  0x78   :  { %v17_v5 = vsub.f32 %v12_v0, %v16_v4 }
  0x7a   :  { %v18_v6 = vmul.f32 1.442695, %v17_v5 }
  0x7c   :  { %84 = vpow2.f32 %v18_v6 }
  0x82   :  { %v85_v7 = vpop.eup %84 }
  0x83   :  { %v20_v8 = vsel %vm13_vm0, %v85_v7, 0.0 }
  0x84   :  { %21 = vadd.xlane.f32.xlu1 %v20_v8 }
  0x8a   :  { %v30_v11 = vpop.permute.xlu0 %29 }
  0x8b   :  { %vm31_vm1 = vcmp.eq.s32.totalorder %v26_v10, %v30_v11 }
  0x8c   :  { %v32_v12 = vsel %vm31_vm1, %v17_v5, 0.0 }
  0x8d   :  { %v33_v13 = vsel %vm13_vm0, %v32_v12, 0.0 }
  0x8e   :  { %34 = vadd.xlane.f32.xlu1 %v33_v13 }
  0xf7   :  { %v22_v14 = vpop.xlane.xlu1 %21 }
  0xf8   :  { %86 = vlog2.f32 %v22_v14 }
  0xfe   :  { %v87_v15 = vpop.eup %86 }
  0xff   :  { %v24_v16 = vmul.f32 0.6931472, %v87_v15 }
 0x101   :  { %v35_v17 = vpop.xlane.xlu1 %34 }
 0x102   :  { %v36_v18 = vsub.f32 %v24_v16, %v35_v17 }
 0x104   :  { %v45_v19 = vsel %vm43_vm2, %v36_v18, 0.0 }
 0x105   :  { %v47_v20 = vsel %vm46_vm3, %v45_v19, 0.0 }
 0x106   :  { %48 = vadd.xlane.f32.xlu2 %v47_v20 }
 0x179   :  { %v49_v21 = vpop.xlane.xlu2 %48 }
 0x17a   :  { %v50_v22 = vrot.slane %v49_v21, 4 }
 0x17c   :  { %v51_v23 = vadd.f32 %v50_v22, %v49_v21 }
 0x17e   :  { %v52_v24 = vrot.slane %v51_v23, 2 }
 0x180   :  { %v53_v25 = vadd.f32 %v52_v24, %v51_v23 }
 0x182   :  { %v54_v26 = vrot.slane %v53_v25, 1 }
 0x184   :  { %v55_v27 = vadd.f32 %v54_v26, %v53_v25 }
 0x186   :  { %79 = vpush %v55_v27 }
 0x1b7   :  { %s80_s16 = spop %79 }
 0x1b8   :  { %v60_v29 = vstv %s80_s16 }
 0x1b9   :  { %v61_v30 = vsel %vm59_vm6, %v60_v29, 0.0 }
 0x1ba   :  { %62 = vst [vmem:[#allocation2] sm:$0xff] %v61_v30 }
 0x1bb   :  { %73 = dma.vmem_to_hbm [thread:$0]  %s69_s1, 128, %s71_s15, [#allocation3]  }
 0x1bc   :  { %112 = dma.done.wait [#allocation3], 128  }
 0x1bd   :  { %113 = vsyncadd [#allocation3], 4294967168 }
 0x1be   :  { %78 = vsyncpa [#allocation3], 1 }

</bundles_post_ra>
